<compile_context>
chip_gen: v7x
topology: tpu7x:2x2x1
jax: 0.10.0
libtpu: 0.0.40
codegen_flags: <defaults>
</compile_context>

<pallas_src>
import functools

import jax
import jax.numpy as jnp
from jax.experimental import pallas as pl
from jax.experimental.pallas import tpu as pltpu


# ----------------------------- small helpers ------------------------------ #

def _round_up(n, m):
    return ((n + m - 1) // m) * m


def _sublane_multiple(dtype):
    # Rows per vreg sublane group: f32 -> 8, bf16 -> 16, int8/fp8 -> 32.
    return {4: 8, 2: 16, 1: 32}.get(jnp.dtype(dtype).itemsize, 8)


def _maybe_pad_dim(n, mult=128, max_inflation=2.0):
    # Pad a feature dim to a lane multiple only if the inflation is modest.
    p = _round_up(n, mult)
    return p if p <= max_inflation * n else n


def _vmem_cap_bytes():
    # Generation-aware VMEM ceiling (~0.8x physical), with a conservative
    # fallback that also fits v7x's 64 MiB physical VMEM.
    try:
        cap = int(pltpu.get_tpu_info().vmem_capacity_bytes)
        if cap > 0:
            return int(cap * 0.8)
    except Exception:
        pass
    return 48 * 1024 * 1024


def _plan_vmem_bytes(tb, in_p, h_p, o_p, th, itemsize, resident):
    if resident:
        # Single-buffered resident weights + biases (Buffered(1)).
        w_bytes = (in_p * h_p + h_p * o_p + h_p + o_p) * itemsize
        th_eff = h_p
    else:
        # Hidden-tiled weights are streamed -> double-buffered per step.
        w_bytes = 2 * (in_p * th + th * o_p + th + o_p) * itemsize
        th_eff = th
    tiles = 2 * tb * (in_p + o_p) * itemsize      # double-buffered x / out tiles
    interm = 4 * tb * (th_eff + o_p)              # f32 hidden + accumulator
    return w_bytes + tiles + interm


def _resident_spec(block_shape, index_map):
    # Constant-index (VMEM-resident) operand: never re-fetched across the grid,
    # so single-buffer it. Fall back if this jax has no pipeline_mode kwarg.
    try:
        return pl.BlockSpec(block_shape, index_map, pipeline_mode=pl.Buffered(1))
    except TypeError:
        return pl.BlockSpec(block_shape, index_map)


def _pick_hidden_tile(h_p, weight_bytes, vmem_cap, hidden_tile):
    """Return None for the resident-weight path, else the hidden tile size."""
    if hidden_tile is not None and h_p % int(hidden_tile) == 0:
        return int(hidden_tile)
    if weight_bytes <= vmem_cap // 2:
        return None                      # weights comfortably VMEM-resident
    for th in (512, 256, 128):
        if h_p % th == 0:
            return th
    return None                          # can't tile cleanly; stay resident


# -------------------------------- kernels --------------------------------- #

def mlp_kernel(x_ref, w1_ref, b1_ref, w2_ref, b2_ref, o_ref, *, act_dtype):
    """Fused Linear -> Tanh -> Linear for one batch tile, weights resident."""
    h = jnp.dot(x_ref[...], w1_ref[...], preferred_element_type=jnp.float32)
    # Bias add in f32; tanh in act_dtype (bf16 on the bf16 path -> cheaper
    # EUP/VPU work on v6e/v7x; f32 otherwise, which is the v5e-safe path).
    h = jnp.tanh((h + b1_ref[...].astype(jnp.float32)).astype(act_dtype))
    o = jnp.dot(h.astype(w2_ref.dtype), w2_ref[...],
                preferred_element_type=jnp.float32)
    o_ref[...] = (o + b2_ref[...].astype(jnp.float32)).astype(o_ref.dtype)


def mlp_kernel_htiled(x_ref, w1_ref, b1_ref, w2_ref, b2_ref, o_ref, acc_ref,
                      *, act_dtype):
    """Hidden-tiled fallback: reduction over hidden tiles into an f32 acc."""
    k = pl.program_id(1)

    @pl.when(k == 0)
    def _():
        acc_ref[...] = jnp.zeros_like(acc_ref)

    h = jnp.dot(x_ref[...], w1_ref[...], preferred_element_type=jnp.float32)
    h = jnp.tanh((h + b1_ref[...].astype(jnp.float32)).astype(act_dtype))
    acc_ref[...] += jnp.dot(h.astype(w2_ref.dtype), w2_ref[...],
                            preferred_element_type=jnp.float32)

    @pl.when(k == pl.num_programs(1) - 1)
    def _():
        o_ref[...] = (acc_ref[...]
                      + b2_ref[...].astype(jnp.float32)).astype(o_ref.dtype)


# ------------------------------- wrappers ---------------------------------- #

def prepare_params(w1, b1, w2, b2):
    """Pad/align parameters ONCE (hoisted out of the forward path).

    w1: [in, hidden], b1: [1, hidden], w2: [hidden, out], b2: [1, out]
    (pre-transposed so the kernel computes x @ W + b == nn.Linear(x)).
    Feature dims are padded to 128 only when the inflation is < 2x; zero
    padding is exact for this MLP (tanh(0)=0 meets zero W2 rows).
    """
    In, H = w1.shape
    O = w2.shape[1]
    in_p, h_p, o_p = _maybe_pad_dim(In), _maybe_pad_dim(H), _maybe_pad_dim(O)

    def pad2(a, rows, cols):
        if a.shape == (rows, cols):
            return a
        return jnp.zeros((rows, cols), a.dtype).at[:a.shape[0], :a.shape[1]].set(a)

    return (pad2(w1, in_p, h_p), pad2(b1, 1, h_p),
            pad2(w2, h_p, o_p), pad2(b2, 1, o_p))


@functools.partial(jax.jit,
                   static_argnames=("out_features", "batch_tile", "hidden_tile"))
def mlp_forward(x, w1, b1, w2, b2, *, out_features=None, batch_tile=None,
                hidden_tile=None):
    """x: [B, in]; params as returned by prepare_params (possibly padded)."""
    B, In = x.shape
    in_p, h_p = w1.shape
    o_p = w2.shape[1]
    O = int(out_features) if out_features is not None else o_p
    dtype = x.dtype
    itemsize = jnp.dtype(dtype).itemsize
    # bf16 activation math on the bf16 path (v6e/v7x fast path); f32 otherwise.
    act_dtype = jnp.bfloat16 if dtype == jnp.bfloat16 else jnp.float32

    vmem_cap = _vmem_cap_bytes()
    weight_bytes = (in_p * h_p + h_p * o_p + h_p + o_p) * itemsize
    th = _pick_hidden_tile(h_p, weight_bytes, vmem_cap, hidden_tile)
    resident = th is None

    # Batch tile: big tiles amortize the ~0.35us/step overhead; round to the
    # dtype's sublane packing; clamp so the whole VMEM plan fits.
    sub = _sublane_multiple(dtype)
    b_al = _round_up(B, sub)
    if batch_tile is None:
        tb = 512
        while tb > 128 and _plan_vmem_bytes(tb, in_p, h_p, o_p, th or h_p,
                                            itemsize, resident) > vmem_cap:
            tb //= 2
    else:
        tb = int(batch_tile)
    tb = max(min(_round_up(tb, sub), b_al), sub)
    # v7x: the "parallel" batch axis shards across 2 TensorCores; when the
    # batch is big enough keep >= 4 grid steps so each core still pipelines.
    if b_al >= 4 * 256 and pl.cdiv(b_al, tb) < 4:
        tb = _round_up(pl.cdiv(b_al, 4), sub)

    b_p = pl.cdiv(B, tb) * tb
    if (b_p, in_p) != (B, In):
        x = jnp.zeros((b_p, in_p), dtype).at[:B, :In].set(x)

    if resident:
        grid = (b_p // tb,)
        kernel = functools.partial(mlp_kernel, act_dtype=act_dtype)
        in_specs = [
            # Batch-tiled input: new block per step -> double-buffered.
            pl.BlockSpec((tb, in_p), lambda i: (i, 0)),
            # Weights / biases: constant block index -> VMEM-resident, 1-buffer.
            _resident_spec((in_p, h_p), lambda i: (0, 0)),
            _resident_spec((1, h_p), lambda i: (0, 0)),
            _resident_spec((h_p, o_p), lambda i: (0, 0)),
            _resident_spec((1, o_p), lambda i: (0, 0)),
        ]
        out_specs = pl.BlockSpec((tb, o_p), lambda i: (i, 0))
        scratch = []
        semantics = ("parallel",)
    else:
        grid = (b_p // tb, h_p // th)
        kernel = functools.partial(mlp_kernel_htiled, act_dtype=act_dtype)
        in_specs = [
            pl.BlockSpec((tb, in_p), lambda i, k: (i, 0)),
            pl.BlockSpec((in_p, th), lambda i, k: (0, k)),
            pl.BlockSpec((1, th), lambda i, k: (0, k)),
            pl.BlockSpec((th, o_p), lambda i, k: (k, 0)),
            pl.BlockSpec((1, o_p), lambda i, k: (0, 0)),
        ]
        out_specs = pl.BlockSpec((tb, o_p), lambda i, k: (i, 0))
        scratch = [pltpu.VMEM((tb, o_p), jnp.float32)]
        semantics = ("parallel", "arbitrary")   # reduction axis last

    plan = _plan_vmem_bytes(tb, in_p, h_p, o_p, th or h_p, itemsize, resident)
    vmem_limit = int(min(max(2 * plan, 32 * 1024 * 1024), vmem_cap))

    out_p = pl.pallas_call(
        kernel,
        out_shape=jax.ShapeDtypeStruct((b_p, o_p), dtype),
        grid=grid,
        in_specs=in_specs,
        out_specs=out_specs,
        scratch_shapes=scratch,
        compiler_params=pltpu.CompilerParams(
            dimension_semantics=semantics,
            vmem_limit_bytes=vmem_limit,
        ),
    )(x, w1, b1, w2, b2)

    # Strip compute-only batch/feature padding.
    return out_p[:B, :O]


def init_params(key, input_size, hidden_size, output_size, dtype=jnp.float32):
    # Deterministic init mimicking PyTorch nn.Linear's U(-1/sqrt(fan_in), ...),
    # stored pre-transposed as [in, out] so the kernel computes x @ W + b.
    k1, k2, k3, k4 = jax.random.split(key, 4)
    bound1 = 1.0 / (input_size ** 0.5)
    bound2 = 1.0 / (hidden_size ** 0.5)
    w1 = jax.random.uniform(k1, (input_size, hidden_size), dtype, -bound1, bound1)
    b1 = jax.random.uniform(k2, (1, hidden_size), dtype, -bound1, bound1)
    w2 = jax.random.uniform(k3, (hidden_size, output_size), dtype, -bound2, bound2)
    b2 = jax.random.uniform(k4, (1, output_size), dtype, -bound2, bound2)
    return w1, b1, w2, b2


if __name__ == "__main__":
    input_size, hidden_size, output_size = 16, 32, 8
    batch = 256

    key = jax.random.PRNGKey(0)
    kx, kp = jax.random.split(key)
    x = jax.random.normal(kx, (batch, input_size), jnp.float32)
    w1, b1, w2, b2 = init_params(kp, input_size, hidden_size, output_size)

    # Pure-JAX reference (same math as the PyTorch MLP.forward).
    ref = jnp.tanh(x @ w1 + b1) @ w2 + b2

    # Pad/align the parameters ONCE (hoisted out of the forward path).
    pw1, pb1, pw2, pb2 = prepare_params(w1, b1, w2, b2)

    # 1) f32 path, default (large) batch tile.
    out = mlp_forward(x, pw1, pb1, pw2, pb2, out_features=output_size)
    out = jax.block_until_ready(out)
    assert out.shape == (batch, output_size)
    assert jnp.allclose(out, ref, atol=1e-5, rtol=1e-5)

    # 2) f32 path with a smaller explicit batch tile (multi-step parallel grid).
    out_tiled = mlp_forward(x, pw1, pb1, pw2, pb2, out_features=output_size,
                            batch_tile=128)
    out_tiled = jax.block_until_ready(out_tiled)
    assert jnp.allclose(out_tiled, ref, atol=1e-5, rtol=1e-5)

    # 3) bf16 MXU fast path (v6e/v7x): x / weights bf16, biases stay f32,
    #    accumulation stays f32 inside the kernel.
    bf = lambda a: a.astype(jnp.bfloat16)
    out_bf16 = mlp_forward(bf(x), bf(pw1), pb1, bf(pw2), pb2,
                           out_features=output_size)
    out_bf16 = jax.block_until_ready(out_bf16)
    assert jnp.allclose(out_bf16.astype(jnp.float32), ref, atol=5e-2, rtol=5e-2)

    # 4) Hidden-tiled fallback (auto-selected when weights exceed the per-chip
    #    VMEM budget); forced here at a small hidden size to exercise the path.
    hs2 = 256
    w1b, b1b, w2b, b2b = init_params(jax.random.PRNGKey(1), input_size, hs2,
                                     output_size)
    refb = jnp.tanh(x @ w1b + b1b) @ w2b + b2b
    pw1b, pb1b, pw2b, pb2b = prepare_params(w1b, b1b, w2b, b2b)
    out_ht = mlp_forward(x, pw1b, pb1b, pw2b, pb2b, out_features=output_size,
                         hidden_tile=128)
    out_ht = jax.block_until_ready(out_ht)
    assert jnp.allclose(out_ht, refb, atol=1e-4, rtol=1e-4)

    print("KERNEL_OK")
</pallas_src>

<mosaic_0001>
module attributes {stable_mosaic.version = 11 : i64} {
  func.func @mlp_kernel(%arg0: i32, %arg1: memref<256x16xf32, #tpu.memory_space<vmem>>, %arg2: memref<16x32xf32, #tpu.memory_space<vmem>>, %arg3: memref<1x32xf32, #tpu.memory_space<vmem>>, %arg4: memref<32x8xf32, #tpu.memory_space<vmem>>, %arg5: memref<1x8xf32, #tpu.memory_space<vmem>>, %arg6: memref<256x8xf32, #tpu.memory_space<vmem>>) attributes {dimension_semantics = [#tpu.dimension_semantics<parallel>], iteration_bounds = array<i64: 1>, scalar_prefetch = 0 : i64, scratch_operands = 0 : i64, tpu.core_type = #tpu.core_type<tc>, window_params = [{transform_indices = @transform_0, window_bounds = array<i64: 256, 16>}, {pipeline_mode = #tpu.pipeline_mode<synchronous>, transform_indices = @transform_1, window_bounds = array<i64: 16, 32>}, {pipeline_mode = #tpu.pipeline_mode<synchronous>, transform_indices = @transform_2, window_bounds = array<i64: 1, 32>}, {pipeline_mode = #tpu.pipeline_mode<synchronous>, transform_indices = @transform_3, window_bounds = array<i64: 32, 8>}, {pipeline_mode = #tpu.pipeline_mode<synchronous>, transform_indices = @transform_4, window_bounds = array<i64: 1, 8>}, {transform_indices = @transform_5, window_bounds = array<i64: 256, 8>}]} {
    %c0 = arith.constant 0 : index
    %c0_0 = arith.constant 0 : index
    %0 = vector.load %arg1[%c0, %c0_0] : memref<256x16xf32, #tpu.memory_space<vmem>>, vector<256x16xf32>
    %c0_1 = arith.constant 0 : index
    %c0_2 = arith.constant 0 : index
    %1 = vector.load %arg2[%c0_1, %c0_2] : memref<16x32xf32, #tpu.memory_space<vmem>>, vector<16x32xf32>
    %cst = arith.constant dense<0.000000e+00> : vector<256x32xf32>
    %2 = tpu.matmul %0, %1, %cst {dimension_numbers = #tpu.dot_dimension_numbers<[1], [0], [0], [1], [0, 0, 1, 1], [], []>} : vector<256x16xf32>, vector<16x32xf32>, vector<256x32xf32> -> vector<256x32xf32>
    %c0_3 = arith.constant 0 : index
    %c0_4 = arith.constant 0 : index
    %3 = vector.load %arg3[%c0_3, %c0_4] : memref<1x32xf32, #tpu.memory_space<vmem>>, vector<1x32xf32>
    %4 = vector.broadcast %3 : vector<1x32xf32> to vector<256x32xf32>
    %5 = arith.addf %2, %4 : vector<256x32xf32>
    %6 = math.tanh %5 : vector<256x32xf32>
    %c0_5 = arith.constant 0 : index
    %c0_6 = arith.constant 0 : index
    %7 = vector.load %arg4[%c0_5, %c0_6] : memref<32x8xf32, #tpu.memory_space<vmem>>, vector<32x8xf32>
    %cst_7 = arith.constant dense<0.000000e+00> : vector<256x8xf32>
    %8 = tpu.matmul %6, %7, %cst_7 {dimension_numbers = #tpu.dot_dimension_numbers<[1], [0], [0], [1], [0, 0, 1, 1], [], []>} : vector<256x32xf32>, vector<32x8xf32>, vector<256x8xf32> -> vector<256x8xf32>
    %c0_8 = arith.constant 0 : index
    %c0_9 = arith.constant 0 : index
    %9 = vector.load %arg5[%c0_8, %c0_9] : memref<1x8xf32, #tpu.memory_space<vmem>>, vector<1x8xf32>
    %10 = vector.broadcast %9 : vector<1x8xf32> to vector<256x8xf32>
    %11 = arith.addf %8, %10 : vector<256x8xf32>
    %c0_10 = arith.constant 0 : index
    %c0_11 = arith.constant 0 : index
    %12 = vector.load %arg6[%c0_10, %c0_11] : memref<256x8xf32, #tpu.memory_space<vmem>>, vector<256x8xf32>
    tpu.vector_store %arg6[%c0_10, %c0_11], %11 {strides = array<i32>} : memref<256x8xf32, #tpu.memory_space<vmem>>, vector<256x8xf32>,
    return
  }
  func.func @transform_0(%arg0: i32) -> (i32, i32) {
    %c0_i32 = arith.constant 0 : i32
    %c0_i32_0 = arith.constant 0 : i32
    return %arg0, %c0_i32 : i32, i32
  }
  func.func @transform_1(%arg0: i32) -> (i32, i32) {
    %c0_i32 = arith.constant 0 : i32
    %c0_i32_0 = arith.constant 0 : i32
    %c0_i32_1 = arith.constant 0 : i32
    return %c0_i32, %c0_i32_0 : i32, i32
  }
  func.func @transform_2(%arg0: i32) -> (i32, i32) {
    %c0_i32 = arith.constant 0 : i32
    %c0_i32_0 = arith.constant 0 : i32
    %c0_i32_1 = arith.constant 0 : i32
    return %c0_i32, %c0_i32_0 : i32, i32
  }
  func.func @transform_3(%arg0: i32) -> (i32, i32) {
    %c0_i32 = arith.constant 0 : i32
    %c0_i32_0 = arith.constant 0 : i32
    %c0_i32_1 = arith.constant 0 : i32
    return %c0_i32, %c0_i32_0 : i32, i32
  }
  func.func @transform_4(%arg0: i32) -> (i32, i32) {
    %c0_i32 = arith.constant 0 : i32
    %c0_i32_0 = arith.constant 0 : i32
    %c0_i32_1 = arith.constant 0 : i32
    return %c0_i32, %c0_i32_0 : i32, i32
  }
  func.func @transform_5(%arg0: i32) -> (i32, i32) {
    %c0_i32 = arith.constant 0 : i32
    %c0_i32_0 = arith.constant 0 : i32
    return %arg0, %c0_i32 : i32, i32
  }
}

</mosaic_0001>

<bundles_post_ra>
// kernel: mlp_forward.1
= control target key start
LH: loop header
LB: loop body
LE: loop exit
PB: predicated region body
PF: predicated region fallthrough
CT: control target
= control target key end

     0   :  { %vm61_vm0 = vcmask 130048   ;;  %vm426_vm1 = vcmask 261120   ;;  %vm748_vm2 = vcmask 64512   ;;  %s1515_s1 = inlined_call_operand.vmem [shape: f32[16,32], index: 1, kind: input, shape index: {}]   ;;  %s1516_s0 = inlined_call_operand.vmem [shape: f32[256,16], index: 0, kind: input, shape index: {}]   ;;  %s1517_s3 = inlined_call_operand.vmem [shape: f32[32,8], index: 3, kind: input, shape index: {}]   ;;  %s1518_s2 = inlined_call_operand.vmem [shape: f32[1,32], index: 2, kind: input, shape index: {}]   ;;  %s1519_s4 = inlined_call_operand.vmem [shape: f32[1,8], index: 4, kind: input, shape index: {}]   ;;  %s1520_s5 = inlined_call_operand.vmem [shape: f32[256,8], index: 5, kind: output, shape index: {}]  }
   0x1   :  { %v52_v0 = vld [vmem:[%s1515_s1] sm:$0xff]  ;;  %v53_v1 = vld [vmem:[%s1515_s1 + $0x8] sm:$0xff]  ;;  %v22_v5 = vld [vmem:[%s1516_s0 + $0x10] sm:$0xff] }
   0x2   :  { %v20_v2 = vld [vmem:[%s1516_s0] sm:$0xff]  ;;  %v1029_v3 = vpack.c.bf16 %v53_v1, %v52_v0  ;;  %v21_v4 = vld [vmem:[%s1516_s0 + $0x8] sm:$0xff]  ;;  %v23_v6 = vld [vmem:[%s1516_s0 + $0x18] sm:$0xff] }
   0x3   :  { %925 = vmatprep.mubr.msk.f32.mxu0 %vm61_vm0, %v20_v2  ;;  %v24_v7 = vld [vmem:[%s1516_s0 + $0x20] sm:$0xff]  ;;  %v25_v8 = vld [vmem:[%s1516_s0 + $0x28] sm:$0xff]  ;;  %v26_v9 = vld [vmem:[%s1516_s0 + $0x30] sm:$0xff] }
   0x4   :  { %1030 = vmatprep.subr.bf16.mxu0 %v1029_v3  ;;  %v27_v10 = vld [vmem:[%s1516_s0 + $0x38] sm:$0xff]  ;;  %v28_v11 = vld [vmem:[%s1516_s0 + $0x40] sm:$0xff]  ;;  %v29_v12 = vld [vmem:[%s1516_s0 + $0x48] sm:$0xff] }
   0x5   :  { %1032 = vmatpush3.bf16.msra.mxu0 %v1029_v3  ;;  %v30_v13 = vld [vmem:[%s1516_s0 + $0x50] sm:$0xff]  ;;  %v31_v14 = vld [vmem:[%s1516_s0 + $0x58] sm:$0xff]  ;;  %v32_v15 = vld [vmem:[%s1516_s0 + $0x60] sm:$0xff] }
   0x6   :  { %v33_v16 = vld [vmem:[%s1516_s0 + $0x68] sm:$0xff]  ;;  %v34_v17 = vld [vmem:[%s1516_s0 + $0x70] sm:$0xff]  ;;  %v35_v18 = vld [vmem:[%s1516_s0 + $0x78] sm:$0xff] }
   0x7   :  { %v36_v19 = vld [vmem:[%s1516_s0 + $0x80] sm:$0xff]  ;;  %v37_v20 = vld [vmem:[%s1516_s0 + $0x88] sm:$0xff]  ;;  %v38_v21 = vld [vmem:[%s1516_s0 + $0x90] sm:$0xff] }
   0x8   :  { %926 = vmatmul.mubr.msk.f32.vlgmr.msra.gmra.mrb[0].mxu0 %vm61_vm0, %v21_v4  ;;  %v39_v22 = vld [vmem:[%s1516_s0 + $0x98] sm:$0xff]  ;;  %v40_v23 = vld [vmem:[%s1516_s0 + $0xa0] sm:$0xff]  ;;  %v41_v24 = vld [vmem:[%s1516_s0 + $0xa8] sm:$0xff] }
   0x9   :  { %928 = vmatprep.mubr.msk.f32.mxu0 %vm61_vm0, %v22_v5  ;;  %v42_v25 = vld [vmem:[%s1516_s0 + $0xb0] sm:$0xff]  ;;  %v43_v26 = vld [vmem:[%s1516_s0 + $0xb8] sm:$0xff]  ;;  %v44_v27 = vld [vmem:[%s1516_s0 + $0xc0] sm:$0xff] }
   0xa   :  { %v45_v28 = vld [vmem:[%s1516_s0 + $0xc8] sm:$0xff]  ;;  %v46_v29 = vld [vmem:[%s1516_s0 + $0xd0] sm:$0xff]  ;;  %v47_v30 = vld [vmem:[%s1516_s0 + $0xd8] sm:$0xff] }
   0xb   :  { %v48_v31 = vld [vmem:[%s1516_s0 + $0xe0] sm:$0xff]  ;;  %v49_v32 = vld [vmem:[%s1516_s0 + $0xe8] sm:$0xff]  ;;  %v50_v33 = vld [vmem:[%s1516_s0 + $0xf0] sm:$0xff] }
   0xc   :  { %929 = vmatmul.mubr.msk.f32.gmra.mrb[2].mxu0 %vm61_vm0, %v23_v6  ;;  %v51_v34 = vld [vmem:[%s1516_s0 + $0xf8] sm:$0xff]  ;;  %v415_v35 = vld [vmem:[%s1517_s3] sm:$0xff]  ;;  %v416_v36 = vld [vmem:[%s1517_s3 + $0x8] sm:$0xff] }
   0xd   :  { %931 = vmatprep.mubr.msk.f32.mxu0 %vm61_vm0, %v24_v7  ;;  %v1033_v37 = vpack.c.bf16 %v416_v36, %v415_v35  ;;  %v417_v38 = vld [vmem:[%s1517_s3 + $0x10] sm:$0xff]  ;;  %v418_v39 = vld [vmem:[%s1517_s3 + $0x18] sm:$0xff]  ;;  %v1284_v41 = vld [vmem:[%s1518_s2] ss:$0 sm:$0xff] }
   0xe   :  { %v1037_v40 = vpack.c.bf16 %v418_v39, %v417_v38 }
   0xf   :  { %1034 = vmatprep.subr.bf16.mxu1 %v1033_v37 }
  0x10   :  { %932 = vmatmul.mubr.msk.f32.gmra.mrb[4].mxu0 %vm61_vm0, %v25_v8  ;;  %1036 = vmatpush3.bf16.msra.mxu1 %v1033_v37 }
  0x11   :  { %934 = vmatprep.mubr.msk.f32.mxu0 %vm61_vm0, %v26_v9  ;;  %1038 = vmatprep.subr.bf16.mxu1 %v1037_v40 }
  0x14   :  { %935 = vmatmul.mubr.msk.f32.gmra.mrb[6].mxu0 %vm61_vm0, %v27_v10  ;;  %1040 = vmatpush3.bf16.msra.mxu1 %v1037_v40 }
  0x15   :  { %937 = vmatprep.mubr.msk.f32.mxu0 %vm61_vm0, %v28_v11 }
  0x18   :  { %938 = vmatmul.mubr.msk.f32.gmra.mrb[8].mxu0 %vm61_vm0, %v29_v12 }
  0x19   :  { %940 = vmatprep.mubr.msk.f32.mxu0 %vm61_vm0, %v30_v13 }
  0x1c   :  { %941 = vmatmul.mubr.msk.f32.gmra.mrb[10].mxu0 %vm61_vm0, %v31_v14 }
  0x1d   :  { %943 = vmatprep.mubr.msk.f32.mxu0 %vm61_vm0, %v32_v15 }
  0x20   :  { %944 = vmatmul.mubr.msk.f32.gmra.mrb[12].mxu0 %vm61_vm0, %v33_v16 }
  0x21   :  { %946 = vmatprep.mubr.msk.f32.mxu0 %vm61_vm0, %v34_v17 }
  0x24   :  { %947 = vmatmul.mubr.msk.f32.gmra.mrb[14].mxu0 %vm61_vm0, %v35_v18 }
  0x25   :  { %949 = vmatprep.mubr.msk.f32.mxu0 %vm61_vm0, %v36_v19 }
  0x28   :  { %950 = vmatmul.mubr.msk.f32.gmra.mrb[16].mxu0 %vm61_vm0, %v37_v20 }
  0x29   :  { %952 = vmatprep.mubr.msk.f32.mxu0 %vm61_vm0, %v38_v21 }
  0x2c   :  { %953 = vmatmul.mubr.msk.f32.gmra.mrb[18].mxu0 %vm61_vm0, %v39_v22 }
  0x2d   :  { %955 = vmatprep.mubr.msk.f32.mxu0 %vm61_vm0, %v40_v23 }
  0x30   :  { %956 = vmatmul.mubr.msk.f32.gmra.mrb[20].mxu0 %vm61_vm0, %v41_v24 }
  0x31   :  { %958 = vmatprep.mubr.msk.f32.mxu0 %vm61_vm0, %v42_v25 }
  0x34   :  { %959 = vmatmul.mubr.msk.f32.gmra.mrb[22].mxu0 %vm61_vm0, %v43_v26 }
  0x35   :  { %961 = vmatprep.mubr.msk.f32.mxu0 %vm61_vm0, %v44_v27 }
  0x38   :  { %962 = vmatmul.mubr.msk.f32.gmra.mrb[24].mxu0 %vm61_vm0, %v45_v28 }
  0x39   :  { %964 = vmatprep.mubr.msk.f32.mxu0 %vm61_vm0, %v46_v29 }
  0x3c   :  { %965 = vmatmul.mubr.msk.f32.gmra.mrb[26].mxu0 %vm61_vm0, %v47_v30 }
  0x3d   :  { %967 = vmatprep.mubr.msk.f32.mxu0 %vm61_vm0, %v48_v31 }
  0x40   :  { %968 = vmatmul.mubr.msk.f32.gmra.mrb[28].mxu0 %vm61_vm0, %v49_v32 }
  0x41   :  { %970 = vmatprep.mubr.msk.f32.mxu0 %vm61_vm0, %v50_v33 }
  0x44   :  { %971 = vmatmul.mubr.msk.f32.gmra.mrb[30].mxu0 %vm61_vm0, %v51_v34 }
  0xdb   :  { %v927_v42 = vpop.f32.mrb[0].mxu0 }
  0xdc   :  { %v230_v43 = vadd.f32 %v927_v42, %v1284_v41  ;;  %v224_v44 = vpop.f32.mrb[1].mxu0 }
  0xdd   :  { %v225_v45 = vadd.f32 %v1284_v41, %v224_v44 }
  0xdf   :  { %1041 = vtanh.f32 %v225_v45  ;;  %v930_v46 = vpop.f32.mrb[2].mxu0 }
  0xe0   :  { %1043 = vtanh.f32 %v230_v43  ;;  %v240_v47 = vadd.f32 %v930_v46, %v1284_v41  ;;  %v234_v48 = vpop.f32.mrb[3].mxu0 }
  0xe1   :  { %v235_v49 = vadd.f32 %v1284_v41, %v234_v48 }
  0xe3   :  { %1045 = vtanh.f32 %v235_v49  ;;  %v933_v50 = vpop.f32.mrb[4].mxu0 }
  0xe4   :  { %1047 = vtanh.f32 %v240_v47  ;;  %v250_v51 = vadd.f32 %v933_v50, %v1284_v41  ;;  %v244_v52 = vpop.f32.mrb[5].mxu0 }
  0xe5   :  { %v245_v53 = vadd.f32 %v1284_v41, %v244_v52 }
  0xe7   :  { %1049 = vtanh.f32 %v245_v53  ;;  %v936_v54 = vpop.f32.mrb[6].mxu0 }
  0xe8   :  { %1051 = vtanh.f32 %v250_v51  ;;  %v260_v55 = vadd.f32 %v936_v54, %v1284_v41  ;;  %v254_v56 = vpop.f32.mrb[7].mxu0 }
  0xe9   :  { %v1042_v57 = vpop.eup %1041  ;;  %v255_v58 = vadd.f32 %v1284_v41, %v254_v56 }
  0xea   :  { %v1044_v59 = vpop.eup %1043  ;;  %981 = vmatprep.mubr.msk.f32.mxu1 %vm426_vm1, %v1042_v57 }
  0xeb   :  { %1053 = vtanh.f32 %v255_v58  ;;  %v939_v60 = vpop.f32.mrb[8].mxu0  ;;  %982 = vmatmul.mubr.msk.f32.vlgmr.msra.gmra.mrb[0].mxu1 %vm426_vm1, %v1044_v59 }
  0xec   :  { %1055 = vtanh.f32 %v260_v55  ;;  %v270_v61 = vadd.f32 %v939_v60, %v1284_v41  ;;  %v264_v62 = vpop.f32.mrb[9].mxu0 }
  0xed   :  { %v1046_v63 = vpop.eup %1045  ;;  %v265_v0 = vadd.f32 %v1284_v41, %v264_v62 }
  0xee   :  { %v1048_v1 = vpop.eup %1047  ;;  %984 = vmatprep.mubr.msk.f32.mxu1 %vm426_vm1, %v1046_v63 }
  0xef   :  { %1057 = vtanh.f32 %v265_v0  ;;  %v942_v2 = vpop.f32.mrb[10].mxu0  ;;  %985 = vmatmul.mubr.msk.f32.gmra.mrb[2].mxu1 %vm426_vm1, %v1048_v1 }
  0xf0   :  { %1059 = vtanh.f32 %v270_v61  ;;  %v280_v3 = vadd.f32 %v942_v2, %v1284_v41  ;;  %v274_v4 = vpop.f32.mrb[11].mxu0 }
  0xf1   :  { %v1050_v5 = vpop.eup %1049  ;;  %v275_v6 = vadd.f32 %v1284_v41, %v274_v4 }
  0xf2   :  { %v1052_v7 = vpop.eup %1051  ;;  %987 = vmatprep.mubr.msk.f32.mxu1 %vm426_vm1, %v1050_v5 }
  0xf3   :  { %1061 = vtanh.f32 %v275_v6  ;;  %v945_v8 = vpop.f32.mrb[12].mxu0  ;;  %988 = vmatmul.mubr.msk.f32.gmra.mrb[4].mxu1 %vm426_vm1, %v1052_v7 }
  0xf4   :  { %1063 = vtanh.f32 %v280_v3  ;;  %v290_v9 = vadd.f32 %v945_v8, %v1284_v41  ;;  %v284_v10 = vpop.f32.mrb[13].mxu0 }
  0xf5   :  { %v1054_v11 = vpop.eup %1053  ;;  %v285_v12 = vadd.f32 %v1284_v41, %v284_v10  ;;  %v1353_v10 = vld [vmem:[%s1519_s4] ss:$0 sm:$0xff] }
  0xf6   :  { %v1056_v13 = vpop.eup %1055  ;;  %990 = vmatprep.mubr.msk.f32.mxu1 %vm426_vm1, %v1054_v11 }
  0xf7   :  { %1065 = vtanh.f32 %v285_v12  ;;  %v948_v14 = vpop.f32.mrb[14].mxu0  ;;  %991 = vmatmul.mubr.msk.f32.gmra.mrb[6].mxu1 %vm426_vm1, %v1056_v13 }
  0xf8   :  { %1067 = vtanh.f32 %v290_v9  ;;  %v300_v15 = vadd.f32 %v948_v14, %v1284_v41  ;;  %v294_v16 = vpop.f32.mrb[15].mxu0 }
  0xf9   :  { %v1058_v17 = vpop.eup %1057  ;;  %v295_v18 = vadd.f32 %v1284_v41, %v294_v16 }
  0xfa   :  { %v1060_v19 = vpop.eup %1059  ;;  %993 = vmatprep.mubr.msk.f32.mxu1 %vm426_vm1, %v1058_v17 }
  0xfb   :  { %1069 = vtanh.f32 %v295_v18  ;;  %v951_v20 = vpop.f32.mrb[16].mxu0  ;;  %994 = vmatmul.mubr.msk.f32.gmra.mrb[8].mxu1 %vm426_vm1, %v1060_v19 }
  0xfc   :  { %1071 = vtanh.f32 %v300_v15  ;;  %v310_v21 = vadd.f32 %v951_v20, %v1284_v41  ;;  %v304_v22 = vpop.f32.mrb[17].mxu0 }
  0xfd   :  { %v1062_v23 = vpop.eup %1061  ;;  %v305_v24 = vadd.f32 %v1284_v41, %v304_v22 }
  0xfe   :  { %v1064_v25 = vpop.eup %1063  ;;  %996 = vmatprep.mubr.msk.f32.mxu1 %vm426_vm1, %v1062_v23 }
  0xff   :  { %1073 = vtanh.f32 %v305_v24  ;;  %v954_v26 = vpop.f32.mrb[18].mxu0  ;;  %997 = vmatmul.mubr.msk.f32.gmra.mrb[10].mxu1 %vm426_vm1, %v1064_v25 }
 0x100   :  { %1075 = vtanh.f32 %v310_v21  ;;  %v320_v27 = vadd.f32 %v954_v26, %v1284_v41  ;;  %v314_v28 = vpop.f32.mrb[19].mxu0 }
 0x101   :  { %v1066_v29 = vpop.eup %1065  ;;  %v315_v30 = vadd.f32 %v1284_v41, %v314_v28 }
 0x102   :  { %v1068_v31 = vpop.eup %1067  ;;  %999 = vmatprep.mubr.msk.f32.mxu1 %vm426_vm1, %v1066_v29 }
 0x103   :  { %1077 = vtanh.f32 %v315_v30  ;;  %v957_v32 = vpop.f32.mrb[20].mxu0  ;;  %1000 = vmatmul.mubr.msk.f32.gmra.mrb[12].mxu1 %vm426_vm1, %v1068_v31 }
 0x104   :  { %1079 = vtanh.f32 %v320_v27  ;;  %v330_v33 = vadd.f32 %v957_v32, %v1284_v41  ;;  %v324_v34 = vpop.f32.mrb[21].mxu0 }
 0x105   :  { %v1070_v35 = vpop.eup %1069  ;;  %v325_v36 = vadd.f32 %v1284_v41, %v324_v34 }
 0x106   :  { %v1072_v37 = vpop.eup %1071  ;;  %1002 = vmatprep.mubr.msk.f32.mxu1 %vm426_vm1, %v1070_v35 }
 0x107   :  { %1081 = vtanh.f32 %v325_v36  ;;  %v960_v38 = vpop.f32.mrb[22].mxu0  ;;  %1003 = vmatmul.mubr.msk.f32.gmra.mrb[14].mxu1 %vm426_vm1, %v1072_v37 }
 0x108   :  { %1083 = vtanh.f32 %v330_v33  ;;  %v340_v39 = vadd.f32 %v960_v38, %v1284_v41  ;;  %v334_v40 = vpop.f32.mrb[23].mxu0 }
 0x109   :  { %v1074_v42 = vpop.eup %1073  ;;  %v335_v43 = vadd.f32 %v1284_v41, %v334_v40 }
 0x10a   :  { %v1076_v44 = vpop.eup %1075  ;;  %1005 = vmatprep.mubr.msk.f32.mxu1 %vm426_vm1, %v1074_v42 }
 0x10b   :  { %1085 = vtanh.f32 %v335_v43  ;;  %v963_v45 = vpop.f32.mrb[24].mxu0  ;;  %1006 = vmatmul.mubr.msk.f32.gmra.mrb[16].mxu1 %vm426_vm1, %v1076_v44 }
 0x10c   :  { %1087 = vtanh.f32 %v340_v39  ;;  %v350_v46 = vadd.f32 %v963_v45, %v1284_v41  ;;  %v344_v47 = vpop.f32.mrb[25].mxu0 }
 0x10d   :  { %v1078_v48 = vpop.eup %1077  ;;  %v345_v49 = vadd.f32 %v1284_v41, %v344_v47 }
 0x10e   :  { %v1080_v50 = vpop.eup %1079  ;;  %1008 = vmatprep.mubr.msk.f32.mxu1 %vm426_vm1, %v1078_v48 }
 0x10f   :  { %1089 = vtanh.f32 %v345_v49  ;;  %v966_v51 = vpop.f32.mrb[26].mxu0  ;;  %1009 = vmatmul.mubr.msk.f32.gmra.mrb[18].mxu1 %vm426_vm1, %v1080_v50 }
 0x110   :  { %1091 = vtanh.f32 %v350_v46  ;;  %v360_v52 = vadd.f32 %v966_v51, %v1284_v41  ;;  %v354_v53 = vpop.f32.mrb[27].mxu0 }
 0x111   :  { %v1082_v54 = vpop.eup %1081  ;;  %v355_v55 = vadd.f32 %v1284_v41, %v354_v53 }
 0x112   :  { %v1084_v56 = vpop.eup %1083  ;;  %1011 = vmatprep.mubr.msk.f32.mxu1 %vm426_vm1, %v1082_v54 }
 0x113   :  { %1093 = vtanh.f32 %v355_v55  ;;  %v969_v57 = vpop.f32.mrb[28].mxu0  ;;  %1012 = vmatmul.mubr.msk.f32.gmra.mrb[20].mxu1 %vm426_vm1, %v1084_v56 }
 0x114   :  { %1095 = vtanh.f32 %v360_v52  ;;  %v370_v58 = vadd.f32 %v969_v57, %v1284_v41  ;;  %v364_v59 = vpop.f32.mrb[29].mxu0 }
 0x115   :  { %v1086_v60 = vpop.eup %1085  ;;  %v365_v61 = vadd.f32 %v1284_v41, %v364_v59 }
 0x116   :  { %v1088_v62 = vpop.eup %1087  ;;  %1014 = vmatprep.mubr.msk.f32.mxu1 %vm426_vm1, %v1086_v60 }
 0x117   :  { %1097 = vtanh.f32 %v365_v61  ;;  %v972_v63 = vpop.f32.mrb[30].mxu0  ;;  %1015 = vmatmul.mubr.msk.f32.gmra.mrb[22].mxu1 %vm426_vm1, %v1088_v62 }
 0x118   :  { %1099 = vtanh.f32 %v370_v58  ;;  %v380_v0 = vadd.f32 %v972_v63, %v1284_v41  ;;  %v374_v1 = vpop.f32.mrb[31].mxu0 }
 0x119   :  { %v1090_v2 = vpop.eup %1089  ;;  %v375_v3 = vadd.f32 %v1284_v41, %v374_v1 }
 0x11a   :  { %v1092_v4 = vpop.eup %1091  ;;  %1017 = vmatprep.mubr.msk.f32.mxu1 %vm426_vm1, %v1090_v2 }
 0x11b   :  { %1101 = vtanh.f32 %v375_v3  ;;  %1018 = vmatmul.mubr.msk.f32.gmra.mrb[24].mxu1 %vm426_vm1, %v1092_v4 }
 0x11c   :  { %1103 = vtanh.f32 %v380_v0 }
 0x11d   :  { %v1094_v5 = vpop.eup %1093 }
 0x11e   :  { %v1096_v6 = vpop.eup %1095  ;;  %1020 = vmatprep.mubr.msk.f32.mxu1 %vm426_vm1, %v1094_v5 }
 0x11f   :  { %1021 = vmatmul.mubr.msk.f32.gmra.mrb[26].mxu1 %vm426_vm1, %v1096_v6 }
 0x121   :  { %v1098_v7 = vpop.eup %1097 }
 0x122   :  { %v1100_v8 = vpop.eup %1099  ;;  %1023 = vmatprep.mubr.msk.f32.mxu1 %vm426_vm1, %v1098_v7 }
 0x123   :  { %1024 = vmatmul.mubr.msk.f32.gmra.mrb[28].mxu1 %vm426_vm1, %v1100_v8 }
 0x125   :  { %v1102_v41 = vpop.eup %1101 }
 0x126   :  { %v1104_v9 = vpop.eup %1103  ;;  %1026 = vmatprep.mubr.msk.f32.mxu1 %vm426_vm1, %v1102_v41 }
 0x127   :  { %1027 = vmatmul.mubr.msk.f32.gmra.mrb[30].mxu1 %vm426_vm1, %v1104_v9 }
 0x1be   :  { %v983_v11 = vpop.f32.mrb[0].mxu1 }
 0x1bf   :  { %v595_v12 = vadd.f32 %v983_v11, %v1353_v10  ;;  %v589_v13 = vpop.f32.mrb[1].mxu1 }
 0x1c0   :  { %v590_v14 = vadd.f32 %v1353_v10, %v589_v13 }
 0x1c1   :  { %750 = vst.msk [vmem:[%s1520_s5 + $0x8] sm:$0xff] %vm748_vm2, %v595_v12 }
 0x1c2   :  { %749 = vst.msk [vmem:[%s1520_s5] sm:$0xff] %vm748_vm2, %v590_v14  ;;  %v986_v15 = vpop.f32.mrb[2].mxu1 }
 0x1c3   :  { %v605_v16 = vadd.f32 %v986_v15, %v1353_v10  ;;  %v599_v17 = vpop.f32.mrb[3].mxu1 }
 0x1c4   :  { %v600_v18 = vadd.f32 %v1353_v10, %v599_v17 }
 0x1c5   :  { %752 = vst.msk [vmem:[%s1520_s5 + $0x18] sm:$0xff] %vm748_vm2, %v605_v16 }
 0x1c6   :  { %751 = vst.msk [vmem:[%s1520_s5 + $0x10] sm:$0xff] %vm748_vm2, %v600_v18  ;;  %v989_v19 = vpop.f32.mrb[4].mxu1 }
 0x1c7   :  { %v615_v20 = vadd.f32 %v989_v19, %v1353_v10  ;;  %v609_v21 = vpop.f32.mrb[5].mxu1 }
 0x1c8   :  { %v610_v22 = vadd.f32 %v1353_v10, %v609_v21 }
 0x1c9   :  { %754 = vst.msk [vmem:[%s1520_s5 + $0x28] sm:$0xff] %vm748_vm2, %v615_v20 }
 0x1ca   :  { %753 = vst.msk [vmem:[%s1520_s5 + $0x20] sm:$0xff] %vm748_vm2, %v610_v22  ;;  %v992_v23 = vpop.f32.mrb[6].mxu1 }
 0x1cb   :  { %v625_v24 = vadd.f32 %v992_v23, %v1353_v10  ;;  %v619_v25 = vpop.f32.mrb[7].mxu1 }
 0x1cc   :  { %v620_v26 = vadd.f32 %v1353_v10, %v619_v25 }
 0x1cd   :  { %756 = vst.msk [vmem:[%s1520_s5 + $0x38] sm:$0xff] %vm748_vm2, %v625_v24 }
 0x1ce   :  { %755 = vst.msk [vmem:[%s1520_s5 + $0x30] sm:$0xff] %vm748_vm2, %v620_v26  ;;  %v995_v27 = vpop.f32.mrb[8].mxu1 }
 0x1cf   :  { %v635_v28 = vadd.f32 %v995_v27, %v1353_v10  ;;  %v629_v29 = vpop.f32.mrb[9].mxu1 }
 0x1d0   :  { %v630_v30 = vadd.f32 %v1353_v10, %v629_v29 }
 0x1d1   :  { %758 = vst.msk [vmem:[%s1520_s5 + $0x48] sm:$0xff] %vm748_vm2, %v635_v28 }
 0x1d2   :  { %757 = vst.msk [vmem:[%s1520_s5 + $0x40] sm:$0xff] %vm748_vm2, %v630_v30  ;;  %v998_v31 = vpop.f32.mrb[10].mxu1 }
 0x1d3   :  { %v645_v32 = vadd.f32 %v998_v31, %v1353_v10  ;;  %v639_v33 = vpop.f32.mrb[11].mxu1 }
 0x1d4   :  { %v640_v34 = vadd.f32 %v1353_v10, %v639_v33 }
 0x1d5   :  { %760 = vst.msk [vmem:[%s1520_s5 + $0x58] sm:$0xff] %vm748_vm2, %v645_v32 }
 0x1d6   :  { %759 = vst.msk [vmem:[%s1520_s5 + $0x50] sm:$0xff] %vm748_vm2, %v640_v34  ;;  %v1001_v35 = vpop.f32.mrb[12].mxu1 }
 0x1d7   :  { %v655_v36 = vadd.f32 %v1001_v35, %v1353_v10  ;;  %v649_v37 = vpop.f32.mrb[13].mxu1 }
 0x1d8   :  { %v650_v38 = vadd.f32 %v1353_v10, %v649_v37 }
 0x1d9   :  { %762 = vst.msk [vmem:[%s1520_s5 + $0x68] sm:$0xff] %vm748_vm2, %v655_v36 }
 0x1da   :  { %761 = vst.msk [vmem:[%s1520_s5 + $0x60] sm:$0xff] %vm748_vm2, %v650_v38  ;;  %v1004_v39 = vpop.f32.mrb[14].mxu1 }
 0x1db   :  { %v665_v40 = vadd.f32 %v1004_v39, %v1353_v10  ;;  %v659_v42 = vpop.f32.mrb[15].mxu1 }
 0x1dc   :  { %v660_v43 = vadd.f32 %v1353_v10, %v659_v42 }
 0x1dd   :  { %764 = vst.msk [vmem:[%s1520_s5 + $0x78] sm:$0xff] %vm748_vm2, %v665_v40 }
 0x1de   :  { %763 = vst.msk [vmem:[%s1520_s5 + $0x70] sm:$0xff] %vm748_vm2, %v660_v43  ;;  %v1007_v44 = vpop.f32.mrb[16].mxu1 }
 0x1df   :  { %v675_v45 = vadd.f32 %v1007_v44, %v1353_v10  ;;  %v669_v46 = vpop.f32.mrb[17].mxu1 }
 0x1e0   :  { %v670_v47 = vadd.f32 %v1353_v10, %v669_v46 }
 0x1e1   :  { %766 = vst.msk [vmem:[%s1520_s5 + $0x88] sm:$0xff] %vm748_vm2, %v675_v45 }
 0x1e2   :  { %765 = vst.msk [vmem:[%s1520_s5 + $0x80] sm:$0xff] %vm748_vm2, %v670_v47  ;;  %v1010_v48 = vpop.f32.mrb[18].mxu1 }
 0x1e3   :  { %v685_v49 = vadd.f32 %v1010_v48, %v1353_v10  ;;  %v679_v50 = vpop.f32.mrb[19].mxu1 }
 0x1e4   :  { %v680_v51 = vadd.f32 %v1353_v10, %v679_v50 }
 0x1e5   :  { %768 = vst.msk [vmem:[%s1520_s5 + $0x98] sm:$0xff] %vm748_vm2, %v685_v49 }
 0x1e6   :  { %767 = vst.msk [vmem:[%s1520_s5 + $0x90] sm:$0xff] %vm748_vm2, %v680_v51  ;;  %v1013_v52 = vpop.f32.mrb[20].mxu1 }
 0x1e7   :  { %v695_v53 = vadd.f32 %v1013_v52, %v1353_v10  ;;  %v689_v54 = vpop.f32.mrb[21].mxu1 }
 0x1e8   :  { %v690_v55 = vadd.f32 %v1353_v10, %v689_v54 }
 0x1e9   :  { %770 = vst.msk [vmem:[%s1520_s5 + $0xa8] sm:$0xff] %vm748_vm2, %v695_v53 }
 0x1ea   :  { %769 = vst.msk [vmem:[%s1520_s5 + $0xa0] sm:$0xff] %vm748_vm2, %v690_v55  ;;  %v1016_v56 = vpop.f32.mrb[22].mxu1 }
 0x1eb   :  { %v705_v57 = vadd.f32 %v1016_v56, %v1353_v10  ;;  %v699_v58 = vpop.f32.mrb[23].mxu1 }
 0x1ec   :  { %v700_v59 = vadd.f32 %v1353_v10, %v699_v58 }
 0x1ed   :  { %772 = vst.msk [vmem:[%s1520_s5 + $0xb8] sm:$0xff] %vm748_vm2, %v705_v57 }
 0x1ee   :  { %771 = vst.msk [vmem:[%s1520_s5 + $0xb0] sm:$0xff] %vm748_vm2, %v700_v59  ;;  %v1019_v60 = vpop.f32.mrb[24].mxu1 }
 0x1ef   :  { %v715_v61 = vadd.f32 %v1019_v60, %v1353_v10  ;;  %v709_v62 = vpop.f32.mrb[25].mxu1 }
 0x1f0   :  { %v710_v63 = vadd.f32 %v1353_v10, %v709_v62 }
 0x1f1   :  { %774 = vst.msk [vmem:[%s1520_s5 + $0xc8] sm:$0xff] %vm748_vm2, %v715_v61 }
 0x1f2   :  { %773 = vst.msk [vmem:[%s1520_s5 + $0xc0] sm:$0xff] %vm748_vm2, %v710_v63  ;;  %v1022_v0 = vpop.f32.mrb[26].mxu1 }
 0x1f3   :  { %v725_v1 = vadd.f32 %v1022_v0, %v1353_v10  ;;  %v719_v2 = vpop.f32.mrb[27].mxu1 }
 0x1f4   :  { %v720_v3 = vadd.f32 %v1353_v10, %v719_v2 }
 0x1f5   :  { %776 = vst.msk [vmem:[%s1520_s5 + $0xd8] sm:$0xff] %vm748_vm2, %v725_v1 }
 0x1f6   :  { %775 = vst.msk [vmem:[%s1520_s5 + $0xd0] sm:$0xff] %vm748_vm2, %v720_v3  ;;  %v1025_v4 = vpop.f32.mrb[28].mxu1 }
 0x1f7   :  { %v735_v5 = vadd.f32 %v1025_v4, %v1353_v10  ;;  %v729_v6 = vpop.f32.mrb[29].mxu1 }
 0x1f8   :  { %v730_v7 = vadd.f32 %v1353_v10, %v729_v6 }
 0x1f9   :  { %778 = vst.msk [vmem:[%s1520_s5 + $0xe8] sm:$0xff] %vm748_vm2, %v735_v5 }
 0x1fa   :  { %777 = vst.msk [vmem:[%s1520_s5 + $0xe0] sm:$0xff] %vm748_vm2, %v730_v7  ;;  %v1028_v8 = vpop.f32.mrb[30].mxu1 }
 0x1fb   :  { %v745_v41 = vadd.f32 %v1028_v8, %v1353_v10  ;;  %v739_v9 = vpop.f32.mrb[31].mxu1 }
 0x1fc   :  { %v740_v11 = vadd.f32 %v1353_v10, %v739_v9 }
 0x1fd   :  { %780 = vst.msk [vmem:[%s1520_s5 + $0xf8] sm:$0xff] %vm748_vm2, %v745_v41 }
 0x1fe   :  { %779 = vst.msk [vmem:[%s1520_s5 + $0xf0] sm:$0xff] %vm748_vm2, %v740_v11 }

</bundles_post_ra>
